<compile_context>
chip_gen: v7x
topology: tpu7x:2x2x1
jax: 0.10.0
libtpu: 0.0.40
codegen_flags: <defaults>
</compile_context>

<pallas_src>
import math

import jax
import jax.numpy as jnp
from jax.experimental import pallas as pl
from jax.experimental.pallas import tpu as pltpu


# ----------------------------------------------------------------------------
# Scaled-down VGG configuration (stand-in for the injected `features` stack)
# ----------------------------------------------------------------------------
CFG = [8, "M", 16, "M"]      # Conv3x3(pad=1)+ReLU / MaxPool2x2 blocks
IN_CHANNELS = 3
SPATIAL = 16
HIDDEN = 64                  # scaled-down stand-in for 4096
NUM_CLASSES = 10             # scaled-down stand-in for 1000


# ----------------------------------------------------------------------------
# Fused Conv3x3(pad=1) + ReLU + MaxPool2x2 kernel (one MXU matmul, K = 9*Cin)
# ----------------------------------------------------------------------------
def _conv_relu_pool_kernel(p_ref, w_ref, b_ref, o_ref):
    # p_ref: (1, 4*HWo, 9*Cin)  quadrant-ordered im2col patches for one image
    # w_ref: (9*Cin, Cout)      3x3 taps folded into the contraction axis
    # b_ref: (1, Cout)
    # o_ref: (1, HWo, Cout)     pooled output, rows in (ho*Wo + wo) order
    y = jnp.dot(p_ref[0], w_ref[...], preferred_element_type=jnp.float32)
    y = jnp.maximum(y + b_ref[...], 0.0)          # fused bias + ReLU
    hwo = o_ref.shape[1]
    # Quadrant-major row order => 2x2 maxpool is a 4-way max over 8-aligned
    # row slices of the VMEM-resident conv output (free VPU epilogue).
    p0 = y[0 * hwo:1 * hwo]
    p1 = y[1 * hwo:2 * hwo]
    p2 = y[2 * hwo:3 * hwo]
    p3 = y[3 * hwo:4 * hwo]
    o_ref[0] = jnp.maximum(jnp.maximum(p0, p1), jnp.maximum(p2, p3))


def _im2col_quadrant(x):
    """Glue: (N,H,W,Cin) -> (N, H*W, 9*Cin) im2col, rows ordered quadrant-major.

    Row index = q*HWo + (ho*Wo + wo) with q = hi*2 + wi and the conv output
    pixel being (h, w) = (2*ho + hi, 2*wo + wi).  Built as ONE array (no
    (9, N, HW, Cin) stack); XLA fuses pad + slices + concat into one producer.
    """
    n, h, w, c = x.shape
    ho, wo = h // 2, w // 2
    xp = jnp.pad(x, ((0, 0), (1, 1), (1, 1), (0, 0)))
    cols = [xp[:, dy:dy + h, dx:dx + w, :] for dy in range(3) for dx in range(3)]
    pat = jnp.concatenate(cols, axis=-1)                # (N, H, W, 9*Cin)
    pat = pat.reshape(n, ho, 2, wo, 2, 9 * c)           # [n, ho, hi, wo, wi, :]
    pat = pat.transpose(0, 2, 4, 1, 3, 5)               # [n, hi, wi, ho, wo, :]
    return pat.reshape(n, h * w, 9 * c)


def conv_relu_pool(x_nhwc, w9, b):
    """Fused conv3x3(pad=1) + ReLU + maxpool2x2 for one layer.

    x_nhwc: (N, H, W, Cin); w9: (9*Cin, Cout); b: (1, Cout)
    returns (N, Ho, Wo, Cout) with Ho=H//2, Wo=W//2.
    """
    n, h, w, cin = x_nhwc.shape
    cout = w9.shape[1]
    ho, wo = h // 2, w // 2
    hwo = ho * wo
    kdim = 9 * cin
    patches = _im2col_quadrant(x_nhwc)                  # (N, 4*HWo, 9*Cin)

    flops = 2 * n * (4 * hwo) * kdim * cout
    bytes_acc = 4 * (patches.size + w9.size + b.size + n * hwo * cout)

    out = pl.pallas_call(
        _conv_relu_pool_kernel,
        out_shape=jax.ShapeDtypeStruct((n, hwo, cout), jnp.float32),
        grid=(n,),
        in_specs=[
            pl.BlockSpec((1, 4 * hwo, kdim), lambda i: (i, 0, 0)),
            pl.BlockSpec((kdim, cout), lambda i: (0, 0)),
            pl.BlockSpec((1, cout), lambda i: (0, 0)),
        ],
        out_specs=pl.BlockSpec((1, hwo, cout), lambda i: (i, 0, 0)),
        compiler_params=pltpu.CompilerParams(
            dimension_semantics=("parallel",)),
        cost_estimate=pl.CostEstimate(
            flops=flops, transcendentals=0, bytes_accessed=bytes_acc),
    )(patches, w9, b)
    return out.reshape(n, ho, wo, cout)


# ----------------------------------------------------------------------------
# Fused classifier kernel: Linear+ReLU -> Linear+ReLU -> Linear, weights
# resident in VMEM (pre-transposed to (In, Out) at init).
# ----------------------------------------------------------------------------
def _classifier_kernel(x_ref, w1_ref, b1_ref, w2_ref, b2_ref, w3_ref, b3_ref,
                       o_ref):
    h = jnp.dot(x_ref[0], w1_ref[...], preferred_element_type=jnp.float32)
    h = jnp.maximum(h + b1_ref[...], 0.0)
    # TODO(synk): nn.Dropout stochastic (training-mode) masking not implemented; eval-mode identity used.
    h = jnp.dot(h, w2_ref[...], preferred_element_type=jnp.float32)
    h = jnp.maximum(h + b2_ref[...], 0.0)
    o_ref[0] = (jnp.dot(h, w3_ref[...], preferred_element_type=jnp.float32)
                + b3_ref[...])


def classifier(feats, linears):
    """feats: (N, feat_dim) flattened in (hw*C + c) order (w1 pre-permuted)."""
    (w1, b1), (w2, b2), (w3, b3) = linears
    n, din = feats.shape
    ncls = w3.shape[1]
    x3 = feats.reshape(n, 1, din)   # batch on a leading (un-tiled) grid axis

    flops = 2 * n * (w1.size + w2.size + w3.size)
    bytes_acc = 4 * (feats.size + w1.size + w2.size + w3.size
                     + b1.size + b2.size + b3.size + n * ncls)

    out = pl.pallas_call(
        _classifier_kernel,
        out_shape=jax.ShapeDtypeStruct((n, 1, ncls), jnp.float32),
        grid=(n,),
        in_specs=[
            pl.BlockSpec((1, 1, din), lambda i: (i, 0, 0)),
            pl.BlockSpec(w1.shape, lambda i: (0, 0)),
            pl.BlockSpec(b1.shape, lambda i: (0, 0)),
            pl.BlockSpec(w2.shape, lambda i: (0, 0)),
            pl.BlockSpec(b2.shape, lambda i: (0, 0)),
            pl.BlockSpec(w3.shape, lambda i: (0, 0)),
            pl.BlockSpec(b3.shape, lambda i: (0, 0)),
        ],
        out_specs=pl.BlockSpec((1, 1, ncls), lambda i: (i, 0, 0)),
        compiler_params=pltpu.CompilerParams(
            dimension_semantics=("parallel",)),
        cost_estimate=pl.CostEstimate(
            flops=flops, transcendentals=0, bytes_accessed=bytes_acc),
    )(x3, w1, b1, w2, b2, w3, b3)
    return out.reshape(n, ncls)


# ----------------------------------------------------------------------------
# Parameter init (mirrors VGG._initialize_weights) + one-time layout prep
# ----------------------------------------------------------------------------
def init_params(key):
    params = {"convs": [], "linears": []}
    c = IN_CHANNELS
    spatial = SPATIAL
    for v in CFG:
        if v == "M":
            spatial //= 2
            continue
        key, k1 = jax.random.split(key)
        # Conv2d: N(0, sqrt(2 / (kh*kw*out_channels))), bias = 0
        std = math.sqrt(2.0 / (3 * 3 * v))
        w = std * jax.random.normal(k1, (3, 3, c, v), jnp.float32)   # HWIO
        # One-time prep: fold the 3x3 taps into the contraction axis.
        params["convs"].append((w.reshape(9 * c, v),
                                jnp.zeros((1, v), jnp.float32)))
        c = v
    c_last, sp_last = c, spatial
    feat_dim = c_last * sp_last * sp_last
    dims = [(feat_dim, HIDDEN), (HIDDEN, HIDDEN), (HIDDEN, NUM_CLASSES)]
    for idx, (din, dout) in enumerate(dims):
        key, k1 = jax.random.split(key)
        # Linear: N(0, 0.01), bias = 0  (torch (Out, In) layout at init)
        w = 0.01 * jax.random.normal(k1, (dout, din), jnp.float32)
        if idx == 0:
            # One-time prep: permute the input dim from PyTorch's NCHW flatten
            # (c*HW + hw) to the kernel's (hw*C + c) flatten, and transpose to
            # (In, Out) so no per-forward transpose is needed.
            w = (w.reshape(dout, c_last, sp_last * sp_last)
                  .transpose(2, 1, 0)
                  .reshape(din, dout))
        else:
            w = w.T                                           # (In, Out)
        params["linears"].append((w, jnp.zeros((1, dout), jnp.float32)))
    return params


# ----------------------------------------------------------------------------
# Forward pass (matches the PyTorch module: features -> flatten -> classifier)
# ----------------------------------------------------------------------------
def vgg_forward(params, x_nchw):
    # NCHW (PyTorch) -> NHWC (kernel layout)
    x = jnp.transpose(x_nchw, (0, 2, 3, 1)).astype(jnp.float32)
    for w9, b in params["convs"]:
        x = conv_relu_pool(x, w9, b)          # fused conv+ReLU+pool block
    n = x.shape[0]
    feats = x.reshape(n, -1)                  # (N, HWo*C) in (hw*C + c) order
    return classifier(feats, params["linears"])


if __name__ == "__main__":
    key = jax.random.PRNGKey(0)
    key, kx, kp = jax.random.split(key, 3)
    x = jax.random.normal(kx, (2, IN_CHANNELS, SPATIAL, SPATIAL), jnp.float32)
    params = init_params(kp)
    out = jax.jit(vgg_forward)(params, x)
    out = jax.block_until_ready(out)
    assert out.shape == (2, NUM_CLASSES), out.shape
    print("KERNEL_OK")
</pallas_src>

<mosaic_0001>
module attributes {stable_mosaic.version = 11 : i64} {
  func.func @_conv_relu_pool_kernel(%arg0: i32, %arg1: memref<1x256x27xf32, #tpu.memory_space<vmem>>, %arg2: memref<27x8xf32, #tpu.memory_space<vmem>>, %arg3: memref<1x8xf32, #tpu.memory_space<vmem>>, %arg4: memref<1x64x8xf32, #tpu.memory_space<vmem>>) attributes {dimension_semantics = [#tpu.dimension_semantics<parallel>], iteration_bounds = array<i64: 2>, scalar_prefetch = 0 : i64, scratch_operands = 0 : i64, tpu.core_type = #tpu.core_type<tc>, window_params = [{transform_indices = @transform_0, window_bounds = array<i64: 1, 256, 27>}, {pipeline_mode = #tpu.pipeline_mode<synchronous>, transform_indices = @transform_1, window_bounds = array<i64: 27, 8>}, {pipeline_mode = #tpu.pipeline_mode<synchronous>, transform_indices = @transform_2, window_bounds = array<i64: 1, 8>}, {transform_indices = @transform_3, window_bounds = array<i64: 1, 64, 8>}]} {
    %c0 = arith.constant 0 : index
    %c0_0 = arith.constant 0 : index
    %c0_1 = arith.constant 0 : index
    %0 = vector.load %arg1[%c0, %c0_0, %c0_1] : memref<1x256x27xf32, #tpu.memory_space<vmem>>, vector<1x256x27xf32>
    %1 = vector.shape_cast %0 : vector<1x256x27xf32> to vector<256x27xf32>
    %c0_2 = arith.constant 0 : index
    %c0_3 = arith.constant 0 : index
    %2 = vector.load %arg2[%c0_2, %c0_3] : memref<27x8xf32, #tpu.memory_space<vmem>>, vector<27x8xf32>
    %cst = arith.constant dense<0.000000e+00> : vector<256x8xf32>
    %3 = tpu.matmul %1, %2, %cst {dimension_numbers = #tpu.dot_dimension_numbers<[1], [0], [0], [1], [0, 0, 1, 1], [], []>} : vector<256x27xf32>, vector<27x8xf32>, vector<256x8xf32> -> vector<256x8xf32>
    %c0_4 = arith.constant 0 : index
    %c0_5 = arith.constant 0 : index
    %4 = vector.load %arg3[%c0_4, %c0_5] : memref<1x8xf32, #tpu.memory_space<vmem>>, vector<1x8xf32>
    %5 = vector.broadcast %4 : vector<1x8xf32> to vector<256x8xf32>
    %6 = arith.addf %3, %5 : vector<256x8xf32>
    %cst_6 = arith.constant 0.000000e+00 : f32
    %7 = vector.broadcast %cst_6 : f32 to vector<256x8xf32>
    %8 = arith.maximumf %6, %7 : vector<256x8xf32>
    %9 = vector.extract_strided_slice %8 {offsets = [0, 0], sizes = [64, 8], strides = [1, 1]} : vector<256x8xf32> to vector<64x8xf32>
    %10 = vector.extract_strided_slice %8 {offsets = [64, 0], sizes = [64, 8], strides = [1, 1]} : vector<256x8xf32> to vector<64x8xf32>
    %11 = vector.extract_strided_slice %8 {offsets = [128, 0], sizes = [64, 8], strides = [1, 1]} : vector<256x8xf32> to vector<64x8xf32>
    %12 = vector.extract_strided_slice %8 {offsets = [192, 0], sizes = [64, 8], strides = [1, 1]} : vector<256x8xf32> to vector<64x8xf32>
    %13 = arith.maximumf %9, %10 : vector<64x8xf32>
    %14 = arith.maximumf %11, %12 : vector<64x8xf32>
    %15 = arith.maximumf %13, %14 : vector<64x8xf32>
    %c0_7 = arith.constant 0 : index
    %c0_8 = arith.constant 0 : index
    %c0_9 = arith.constant 0 : index
    %16 = vector.load %arg4[%c0_7, %c0_8, %c0_9] : memref<1x64x8xf32, #tpu.memory_space<vmem>>, vector<1x64x8xf32>
    %17 = vector.shape_cast %16 : vector<1x64x8xf32> to vector<64x8xf32>
    %18 = vector.shape_cast %15 : vector<64x8xf32> to vector<1x64x8xf32>
    tpu.vector_store %arg4[%c0_7, %c0_8, %c0_9], %18 {strides = array<i32>} : memref<1x64x8xf32, #tpu.memory_space<vmem>>, vector<1x64x8xf32>,
    return
  }
  func.func @transform_0(%arg0: i32) -> (i32, i32, i32) {
    %c0_i32 = arith.constant 0 : i32
    %c0_i32_0 = arith.constant 0 : i32
    %c0_i32_1 = arith.constant 0 : i32
    return %arg0, %c0_i32, %c0_i32_0 : i32, i32, i32
  }
  func.func @transform_1(%arg0: i32) -> (i32, i32) {
    %c0_i32 = arith.constant 0 : i32
    %c0_i32_0 = arith.constant 0 : i32
    %c0_i32_1 = arith.constant 0 : i32
    return %c0_i32, %c0_i32_0 : i32, i32
  }
  func.func @transform_2(%arg0: i32) -> (i32, i32) {
    %c0_i32 = arith.constant 0 : i32
    %c0_i32_0 = arith.constant 0 : i32
    %c0_i32_1 = arith.constant 0 : i32
    return %c0_i32, %c0_i32_0 : i32, i32
  }
  func.func @transform_3(%arg0: i32) -> (i32, i32, i32) {
    %c0_i32 = arith.constant 0 : i32
    %c0_i32_0 = arith.constant 0 : i32
    %c0_i32_1 = arith.constant 0 : i32
    return %arg0, %c0_i32, %c0_i32_0 : i32, i32, i32
  }
}

module attributes {stable_mosaic.version = 11 : i64} {
  func.func @_conv_relu_pool_kernel(%arg0: i32, %arg1: memref<1x64x72xf32, #tpu.memory_space<vmem>>, %arg2: memref<72x16xf32, #tpu.memory_space<vmem>>, %arg3: memref<1x16xf32, #tpu.memory_space<vmem>>, %arg4: memref<1x16x16xf32, #tpu.memory_space<vmem>>) attributes {dimension_semantics = [#tpu.dimension_semantics<parallel>], iteration_bounds = array<i64: 2>, scalar_prefetch = 0 : i64, scratch_operands = 0 : i64, tpu.core_type = #tpu.core_type<tc>, window_params = [{transform_indices = @transform_0, window_bounds = array<i64: 1, 64, 72>}, {pipeline_mode = #tpu.pipeline_mode<synchronous>, transform_indices = @transform_1, window_bounds = array<i64: 72, 16>}, {pipeline_mode = #tpu.pipeline_mode<synchronous>, transform_indices = @transform_2, window_bounds = array<i64: 1, 16>}, {transform_indices = @transform_3, window_bounds = array<i64: 1, 16, 16>}]} {
    %c0 = arith.constant 0 : index
    %c0_0 = arith.constant 0 : index
    %c0_1 = arith.constant 0 : index
    %0 = vector.load %arg1[%c0, %c0_0, %c0_1] : memref<1x64x72xf32, #tpu.memory_space<vmem>>, vector<1x64x72xf32>
    %1 = vector.shape_cast %0 : vector<1x64x72xf32> to vector<64x72xf32>
    %c0_2 = arith.constant 0 : index
    %c0_3 = arith.constant 0 : index
    %2 = vector.load %arg2[%c0_2, %c0_3] : memref<72x16xf32, #tpu.memory_space<vmem>>, vector<72x16xf32>
    %cst = arith.constant dense<0.000000e+00> : vector<64x16xf32>
    %3 = tpu.matmul %1, %2, %cst {dimension_numbers = #tpu.dot_dimension_numbers<[1], [0], [0], [1], [0, 0, 1, 1], [], []>} : vector<64x72xf32>, vector<72x16xf32>, vector<64x16xf32> -> vector<64x16xf32>
    %c0_4 = arith.constant 0 : index
    %c0_5 = arith.constant 0 : index
    %4 = vector.load %arg3[%c0_4, %c0_5] : memref<1x16xf32, #tpu.memory_space<vmem>>, vector<1x16xf32>
    %5 = vector.broadcast %4 : vector<1x16xf32> to vector<64x16xf32>
    %6 = arith.addf %3, %5 : vector<64x16xf32>
    %cst_6 = arith.constant 0.000000e+00 : f32
    %7 = vector.broadcast %cst_6 : f32 to vector<64x16xf32>
    %8 = arith.maximumf %6, %7 : vector<64x16xf32>
    %9 = vector.extract_strided_slice %8 {offsets = [0, 0], sizes = [16, 16], strides = [1, 1]} : vector<64x16xf32> to vector<16x16xf32>
    %10 = vector.extract_strided_slice %8 {offsets = [16, 0], sizes = [16, 16], strides = [1, 1]} : vector<64x16xf32> to vector<16x16xf32>
    %11 = vector.extract_strided_slice %8 {offsets = [32, 0], sizes = [16, 16], strides = [1, 1]} : vector<64x16xf32> to vector<16x16xf32>
    %12 = vector.extract_strided_slice %8 {offsets = [48, 0], sizes = [16, 16], strides = [1, 1]} : vector<64x16xf32> to vector<16x16xf32>
    %13 = arith.maximumf %9, %10 : vector<16x16xf32>
    %14 = arith.maximumf %11, %12 : vector<16x16xf32>
    %15 = arith.maximumf %13, %14 : vector<16x16xf32>
    %c0_7 = arith.constant 0 : index
    %c0_8 = arith.constant 0 : index
    %c0_9 = arith.constant 0 : index
    %16 = vector.load %arg4[%c0_7, %c0_8, %c0_9] : memref<1x16x16xf32, #tpu.memory_space<vmem>>, vector<1x16x16xf32>
    %17 = vector.shape_cast %16 : vector<1x16x16xf32> to vector<16x16xf32>
    %18 = vector.shape_cast %15 : vector<16x16xf32> to vector<1x16x16xf32>
    tpu.vector_store %arg4[%c0_7, %c0_8, %c0_9], %18 {strides = array<i32>} : memref<1x16x16xf32, #tpu.memory_space<vmem>>, vector<1x16x16xf32>,
    return
  }
  func.func @transform_0(%arg0: i32) -> (i32, i32, i32) {
    %c0_i32 = arith.constant 0 : i32
    %c0_i32_0 = arith.constant 0 : i32
    %c0_i32_1 = arith.constant 0 : i32
    return %arg0, %c0_i32, %c0_i32_0 : i32, i32, i32
  }
  func.func @transform_1(%arg0: i32) -> (i32, i32) {
    %c0_i32 = arith.constant 0 : i32
    %c0_i32_0 = arith.constant 0 : i32
    %c0_i32_1 = arith.constant 0 : i32
    return %c0_i32, %c0_i32_0 : i32, i32
  }
  func.func @transform_2(%arg0: i32) -> (i32, i32) {
    %c0_i32 = arith.constant 0 : i32
    %c0_i32_0 = arith.constant 0 : i32
    %c0_i32_1 = arith.constant 0 : i32
    return %c0_i32, %c0_i32_0 : i32, i32
  }
  func.func @transform_3(%arg0: i32) -> (i32, i32, i32) {
    %c0_i32 = arith.constant 0 : i32
    %c0_i32_0 = arith.constant 0 : i32
    %c0_i32_1 = arith.constant 0 : i32
    return %arg0, %c0_i32, %c0_i32_0 : i32, i32, i32
  }
}

module attributes {stable_mosaic.version = 11 : i64} {
  func.func @_classifier_kernel(%arg0: i32, %arg1: memref<1x1x256xf32, #tpu.memory_space<vmem>>, %arg2: memref<256x64xf32, #tpu.memory_space<vmem>>, %arg3: memref<1x64xf32, #tpu.memory_space<vmem>>, %arg4: memref<64x64xf32, #tpu.memory_space<vmem>>, %arg5: memref<1x64xf32, #tpu.memory_space<vmem>>, %arg6: memref<64x10xf32, #tpu.memory_space<vmem>>, %arg7: memref<1x10xf32, #tpu.memory_space<vmem>>, %arg8: memref<1x1x10xf32, #tpu.memory_space<vmem>>) attributes {dimension_semantics = [#tpu.dimension_semantics<parallel>], iteration_bounds = array<i64: 2>, scalar_prefetch = 0 : i64, scratch_operands = 0 : i64, tpu.core_type = #tpu.core_type<tc>, window_params = [{transform_indices = @transform_0, window_bounds = array<i64: 1, 1, 256>}, {pipeline_mode = #tpu.pipeline_mode<synchronous>, transform_indices = @transform_1, window_bounds = array<i64: 256, 64>}, {pipeline_mode = #tpu.pipeline_mode<synchronous>, transform_indices = @transform_2, window_bounds = array<i64: 1, 64>}, {pipeline_mode = #tpu.pipeline_mode<synchronous>, transform_indices = @transform_3, window_bounds = array<i64: 64, 64>}, {pipeline_mode = #tpu.pipeline_mode<synchronous>, transform_indices = @transform_4, window_bounds = array<i64: 1, 64>}, {pipeline_mode = #tpu.pipeline_mode<synchronous>, transform_indices = @transform_5, window_bounds = array<i64: 64, 10>}, {pipeline_mode = #tpu.pipeline_mode<synchronous>, transform_indices = @transform_6, window_bounds = array<i64: 1, 10>}, {transform_indices = @transform_7, window_bounds = array<i64: 1, 1, 10>}]} {
    %c0 = arith.constant 0 : index
    %c0_0 = arith.constant 0 : index
    %c0_1 = arith.constant 0 : index
    %0 = vector.load %arg1[%c0, %c0_0, %c0_1] : memref<1x1x256xf32, #tpu.memory_space<vmem>>, vector<1x1x256xf32>
    %1 = vector.shape_cast %0 : vector<1x1x256xf32> to vector<1x256xf32>
    %c0_2 = arith.constant 0 : index
    %c0_3 = arith.constant 0 : index
    %2 = vector.load %arg2[%c0_2, %c0_3] : memref<256x64xf32, #tpu.memory_space<vmem>>, vector<256x64xf32>
    %cst = arith.constant dense<0.000000e+00> : vector<1x64xf32>
    %3 = tpu.matmul %1, %2, %cst {dimension_numbers = #tpu.dot_dimension_numbers<[1], [0], [0], [1], [0, 0, 1, 1], [], []>} : vector<1x256xf32>, vector<256x64xf32>, vector<1x64xf32> -> vector<1x64xf32>
    %c0_4 = arith.constant 0 : index
    %c0_5 = arith.constant 0 : index
    %4 = vector.load %arg3[%c0_4, %c0_5] : memref<1x64xf32, #tpu.memory_space<vmem>>, vector<1x64xf32>
    %5 = arith.addf %3, %4 : vector<1x64xf32>
    %cst_6 = arith.constant 0.000000e+00 : f32
    %6 = vector.broadcast %cst_6 : f32 to vector<1x64xf32>
    %7 = arith.maximumf %5, %6 : vector<1x64xf32>
    %c0_7 = arith.constant 0 : index
    %c0_8 = arith.constant 0 : index
    %8 = vector.load %arg4[%c0_7, %c0_8] : memref<64x64xf32, #tpu.memory_space<vmem>>, vector<64x64xf32>
    %cst_9 = arith.constant dense<0.000000e+00> : vector<1x64xf32>
    %9 = tpu.matmul %7, %8, %cst_9 {dimension_numbers = #tpu.dot_dimension_numbers<[1], [0], [0], [1], [0, 0, 1, 1], [], []>} : vector<1x64xf32>, vector<64x64xf32>, vector<1x64xf32> -> vector<1x64xf32>
    %c0_10 = arith.constant 0 : index
    %c0_11 = arith.constant 0 : index
    %10 = vector.load %arg5[%c0_10, %c0_11] : memref<1x64xf32, #tpu.memory_space<vmem>>, vector<1x64xf32>
    %11 = arith.addf %9, %10 : vector<1x64xf32>
    %cst_12 = arith.constant 0.000000e+00 : f32
    %12 = vector.broadcast %cst_12 : f32 to vector<1x64xf32>
    %13 = arith.maximumf %11, %12 : vector<1x64xf32>
    %c0_13 = arith.constant 0 : index
    %c0_14 = arith.constant 0 : index
    %14 = vector.load %arg6[%c0_13, %c0_14] : memref<64x10xf32, #tpu.memory_space<vmem>>, vector<64x10xf32>
    %cst_15 = arith.constant dense<0.000000e+00> : vector<1x10xf32>
    %15 = tpu.matmul %13, %14, %cst_15 {dimension_numbers = #tpu.dot_dimension_numbers<[1], [0], [0], [1], [0, 0, 1, 1], [], []>} : vector<1x64xf32>, vector<64x10xf32>, vector<1x10xf32> -> vector<1x10xf32>
    %c0_16 = arith.constant 0 : index
    %c0_17 = arith.constant 0 : index
    %16 = vector.load %arg7[%c0_16, %c0_17] : memref<1x10xf32, #tpu.memory_space<vmem>>, vector<1x10xf32>
    %17 = arith.addf %15, %16 : vector<1x10xf32>
    %c0_18 = arith.constant 0 : index
    %c0_19 = arith.constant 0 : index
    %c0_20 = arith.constant 0 : index
    %18 = vector.load %arg8[%c0_18, %c0_19, %c0_20] : memref<1x1x10xf32, #tpu.memory_space<vmem>>, vector<1x1x10xf32>
    %19 = vector.shape_cast %18 : vector<1x1x10xf32> to vector<1x10xf32>
    %20 = vector.shape_cast %17 : vector<1x10xf32> to vector<1x1x10xf32>
    tpu.vector_store %arg8[%c0_18, %c0_19, %c0_20], %20 {strides = array<i32>} : memref<1x1x10xf32, #tpu.memory_space<vmem>>, vector<1x1x10xf32>,
    return
  }
  func.func @transform_0(%arg0: i32) -> (i32, i32, i32) {
    %c0_i32 = arith.constant 0 : i32
    %c0_i32_0 = arith.constant 0 : i32
    %c0_i32_1 = arith.constant 0 : i32
    return %arg0, %c0_i32, %c0_i32_0 : i32, i32, i32
  }
  func.func @transform_1(%arg0: i32) -> (i32, i32) {
    %c0_i32 = arith.constant 0 : i32
    %c0_i32_0 = arith.constant 0 : i32
    %c0_i32_1 = arith.constant 0 : i32
    return %c0_i32, %c0_i32_0 : i32, i32
  }
  func.func @transform_2(%arg0: i32) -> (i32, i32) {
    %c0_i32 = arith.constant 0 : i32
    %c0_i32_0 = arith.constant 0 : i32
    %c0_i32_1 = arith.constant 0 : i32
    return %c0_i32, %c0_i32_0 : i32, i32
  }
  func.func @transform_3(%arg0: i32) -> (i32, i32) {
    %c0_i32 = arith.constant 0 : i32
    %c0_i32_0 = arith.constant 0 : i32
    %c0_i32_1 = arith.constant 0 : i32
    return %c0_i32, %c0_i32_0 : i32, i32
  }
  func.func @transform_4(%arg0: i32) -> (i32, i32) {
    %c0_i32 = arith.constant 0 : i32
    %c0_i32_0 = arith.constant 0 : i32
    %c0_i32_1 = arith.constant 0 : i32
    return %c0_i32, %c0_i32_0 : i32, i32
  }
  func.func @transform_5(%arg0: i32) -> (i32, i32) {
    %c0_i32 = arith.constant 0 : i32
    %c0_i32_0 = arith.constant 0 : i32
    %c0_i32_1 = arith.constant 0 : i32
    return %c0_i32, %c0_i32_0 : i32, i32
  }
  func.func @transform_6(%arg0: i32) -> (i32, i32) {
    %c0_i32 = arith.constant 0 : i32
    %c0_i32_0 = arith.constant 0 : i32
    %c0_i32_1 = arith.constant 0 : i32
    return %c0_i32, %c0_i32_0 : i32, i32
  }
  func.func @transform_7(%arg0: i32) -> (i32, i32, i32) {
    %c0_i32 = arith.constant 0 : i32
    %c0_i32_0 = arith.constant 0 : i32
    %c0_i32_1 = arith.constant 0 : i32
    return %arg0, %c0_i32, %c0_i32_0 : i32, i32, i32
  }
}

</mosaic_0001>

<bundles_post_ra>
// kernel: vgg_forward.3
= control target key start
LH: loop header
LB: loop body
LE: loop exit
PB: predicated region body
PF: predicated region fallthrough
CT: control target
= control target key end

     0   :  { %s851_s12 = smov 0   ;;  %s1047_s0 = inlined_call_operand.vmem [shape: f32[2,256,27], index: 0, kind: input, shape index: {}]   ;;  %s1048_s1 = inlined_call_operand.vmem [shape: f32[27,8], index: 1, kind: input, shape index: {}]   ;;  %s1049_s2 = inlined_call_operand.vmem [shape: f32[1,8], index: 2, kind: input, shape index: {}]   ;;  %s1050_s3 = inlined_call_operand.vmem [shape: f32[2,64,8], index: 3, kind: output, shape index: {}]  }
   0x1 LB: > { %s660_s13 = sadd.s32 4294967295, %s828_s12   ;;  %p664_p0 = scmp.ge.s32.totalorder %s828_s12, 1  ;;  %s828_s12 = sphi %s851_s12, %s13_s12  }
   0x2   : > { %p137_p1 = scmp.lt.s32.totalorder %s828_s12, 3 }
   0x4   : > { %p138_p2 = pnand %p664_p0, %p137_p1 }
   0x5   : > { %v203_v0 = vld [vmem:[%s1048_s1] sm:$0xff] (!%p138_p2)  ;;  %v204_v1 = vld [vmem:[%s1048_s1 + $0x8] sm:$0xff] (!%p138_p2)  ;;  %v205_v2 = vld [vmem:[%s1048_s1 + $0x10] sm:$0xff] (!%p138_p2)  ;;  %vm311_vm0 = vcmask (!%p138_p2), 1042432   ;;  %p161_p3 = scmp.lt.s32.totalorder (!%p138_p2), %s660_s13, 1  ;;  %vm830_vm1 = vmmov (!%p138_p2), 1  }
   0x6   : > { %141 = sbr.rel (%p138_p2) target bundleno = 269 (0x10d), region = 32  ;;  %v799_v3 = vpack.c.bf16 (!%p138_p2), %v204_v1, %v203_v0  ;;  %v206_v4 = vld [vmem:[%s1048_s1 + $0x18] sm:$0x7] (!%p138_p2)  ;;  %vm871_vm2 = vmpackc.low (!%p138_p2), %vm311_vm0, %vm830_vm1  ;;  %vm214_vm3 = vcmask (!%p138_p2), 220160   ;;  %v958_v47 = vld [vmem:[%s1049_s2] ss:$0 sm:$0xff] (!%p138_p2) }
   0x7   : > { %v803_v5 = vpack.c.bf16 (!%p138_p2), %v206_v4, %v205_v2  ;;  %vm596_vm4 = vcmask (!%p138_p2), 64512  }
   0x8   : > { %800 = vmatprep.subr.bf16.mxu0 (!%p138_p2), %v799_v3  ;;  %809 = vmatprep.subr.bf16.mxu1 (!%p138_p2), %v799_v3 }
   0x9   : > { %802 = vmatpush3.bf16.msra.mxu0 (!%p138_p2), %v799_v3  ;;  %811 = vmatpush3.bf16.msra.mxu1 (!%p138_p2), %v799_v3 }
   0xa   : > { %805 = vmatprep.subr.msk.bf16.mxu0 (!%p138_p2), %vm871_vm2, %v803_v5  ;;  %810 = vmatprep.subr.msk.bf16.mxu1 (!%p138_p2), %vm871_vm2, %v803_v5 }
   0xd   : > { %s1054_s13 = smov (!%p161_p3, %s660_s13), 1  ;;  %808 = vmatpush3.bf16.msk.msra.mxu0 %vm871_vm2, %v803_v5  ;;  %812 = vmatpush3.bf16.msk.msra.mxu1 %vm871_vm2, %v803_v5 }
   0xe   : > { %s705_s22 = sshll.u32 %s1054_s13, 8  ;;  %s706_s28 = sshll.u32 %s1054_s13, 6 }
   0xf   : > { %s885_s25 = scalar_lea.vmem %s1047_s0, %s705_s22  ;;  %s1012_s4 = scalar_lea.vmem %s1050_s3, %s706_s28 }
  0x10   : > { %v171_v7 = vld [vmem:[%s885_s25] sm:$0xff]  ;;  %v172_v9 = vld [vmem:[%s885_s25 + $0x8] sm:$0xff]  ;;  %v173_v11 = vld [vmem:[%s885_s25 + $0x10] sm:$0xff] }
  0x11   : > { %v187_v8 = vld [vmem:[%s885_s25 + $0x80] sm:$0xff]  ;;  %751 = vmatprep.mubr.msk.f32.mxu0 %vm214_vm3, %v171_v7  ;;  %v188_v10 = vld [vmem:[%s885_s25 + $0x88] sm:$0xff]  ;;  %v189_v12 = vld [vmem:[%s885_s25 + $0x90] sm:$0xff] }
  0x12   : > { %775 = vmatprep.mubr.msk.f32.mxu1 %vm214_vm3, %v187_v8  ;;  %752 = vmatmul.mubr.msk.f32.vlgmr.msra.gmra.mrb[0].mxu0 %vm214_vm3, %v172_v9  ;;  %v174_v13 = vld [vmem:[%s885_s25 + $0x18] sm:$0xff]  ;;  %v175_v15 = vld [vmem:[%s885_s25 + $0x20] sm:$0xff]  ;;  %v176_v17 = vld [vmem:[%s885_s25 + $0x28] sm:$0xff] }
  0x13   : > { %776 = vmatmul.mubr.msk.f32.vlgmr.msra.gmra.mrb[0].mxu1 %vm214_vm3, %v188_v10  ;;  %754 = vmatprep.mubr.msk.f32.mxu0 %vm214_vm3, %v173_v11  ;;  %v190_v14 = vld [vmem:[%s885_s25 + $0x98] sm:$0xff]  ;;  %v191_v16 = vld [vmem:[%s885_s25 + $0xa0] sm:$0xff]  ;;  %v192_v18 = vld [vmem:[%s885_s25 + $0xa8] sm:$0xff] }
  0x14   : > { %778 = vmatprep.mubr.msk.f32.mxu1 %vm214_vm3, %v189_v12  ;;  %v177_v19 = vld [vmem:[%s885_s25 + $0x30] sm:$0xff]  ;;  %v178_v21 = vld [vmem:[%s885_s25 + $0x38] sm:$0xff]  ;;  %v179_v23 = vld [vmem:[%s885_s25 + $0x40] sm:$0xff] }
  0x15   : > { %v193_v20 = vld [vmem:[%s885_s25 + $0xb0] sm:$0xff]  ;;  %v194_v22 = vld [vmem:[%s885_s25 + $0xb8] sm:$0xff]  ;;  %v195_v24 = vld [vmem:[%s885_s25 + $0xc0] sm:$0xff] }
  0x16   : > { %755 = vmatmul.mubr.msk.f32.gmra.mrb[2].mxu0 %vm214_vm3, %v174_v13  ;;  %v180_v25 = vld [vmem:[%s885_s25 + $0x48] sm:$0xff]  ;;  %v181_v27 = vld [vmem:[%s885_s25 + $0x50] sm:$0xff]  ;;  %v182_v29 = vld [vmem:[%s885_s25 + $0x58] sm:$0xff] }
  0x17   : > { %779 = vmatmul.mubr.msk.f32.gmra.mrb[2].mxu1 %vm214_vm3, %v190_v14  ;;  %757 = vmatprep.mubr.msk.f32.mxu0 %vm214_vm3, %v175_v15  ;;  %v196_v26 = vld [vmem:[%s885_s25 + $0xc8] sm:$0xff]  ;;  %v197_v28 = vld [vmem:[%s885_s25 + $0xd0] sm:$0xff]  ;;  %v198_v30 = vld [vmem:[%s885_s25 + $0xd8] sm:$0xff] }
  0x18   : > { %781 = vmatprep.mubr.msk.f32.mxu1 %vm214_vm3, %v191_v16  ;;  %v183_v31 = vld [vmem:[%s885_s25 + $0x60] sm:$0xff]  ;;  %v184_v33 = vld [vmem:[%s885_s25 + $0x68] sm:$0xff]  ;;  %v185_v35 = vld [vmem:[%s885_s25 + $0x70] sm:$0xff] }
  0x19   : > { %v199_v32 = vld [vmem:[%s885_s25 + $0xe0] sm:$0xff]  ;;  %v200_v34 = vld [vmem:[%s885_s25 + $0xe8] sm:$0xff]  ;;  %v201_v36 = vld [vmem:[%s885_s25 + $0xf0] sm:$0xff] }
  0x1a   : > { %758 = vmatmul.mubr.msk.f32.gmra.mrb[4].mxu0 %vm214_vm3, %v176_v17  ;;  %v186_v37 = vld [vmem:[%s885_s25 + $0x78] sm:$0xff] }
  0x1b   : > { %782 = vmatmul.mubr.msk.f32.gmra.mrb[4].mxu1 %vm214_vm3, %v192_v18  ;;  %760 = vmatprep.mubr.msk.f32.mxu0 %vm214_vm3, %v177_v19  ;;  %v202_v38 = vld [vmem:[%s885_s25 + $0xf8] sm:$0xff] }
  0x1c   : > { %784 = vmatprep.mubr.msk.f32.mxu1 %vm214_vm3, %v193_v20 }
  0x1e   : > { %761 = vmatmul.mubr.msk.f32.gmra.mrb[6].mxu0 %vm214_vm3, %v178_v21 }
  0x1f   : > { %785 = vmatmul.mubr.msk.f32.gmra.mrb[6].mxu1 %vm214_vm3, %v194_v22  ;;  %763 = vmatprep.mubr.msk.f32.mxu0 %vm214_vm3, %v179_v23 }
  0x20   : > { %787 = vmatprep.mubr.msk.f32.mxu1 %vm214_vm3, %v195_v24 }
  0x22   : > { %764 = vmatmul.mubr.msk.f32.gmra.mrb[8].mxu0 %vm214_vm3, %v180_v25 }
  0x23   : > { %788 = vmatmul.mubr.msk.f32.gmra.mrb[8].mxu1 %vm214_vm3, %v196_v26  ;;  %766 = vmatprep.mubr.msk.f32.mxu0 %vm214_vm3, %v181_v27 }
  0x24   : > { %790 = vmatprep.mubr.msk.f32.mxu1 %vm214_vm3, %v197_v28 }
  0x26   : > { %767 = vmatmul.mubr.msk.f32.gmra.mrb[10].mxu0 %vm214_vm3, %v182_v29 }
  0x27   : > { %791 = vmatmul.mubr.msk.f32.gmra.mrb[10].mxu1 %vm214_vm3, %v198_v30  ;;  %769 = vmatprep.mubr.msk.f32.mxu0 %vm214_vm3, %v183_v31 }
  0x28   : > { %793 = vmatprep.mubr.msk.f32.mxu1 %vm214_vm3, %v199_v32 }
  0x2a   : > { %770 = vmatmul.mubr.msk.f32.gmra.mrb[12].mxu0 %vm214_vm3, %v184_v33 }
  0x2b   : > { %794 = vmatmul.mubr.msk.f32.gmra.mrb[12].mxu1 %vm214_vm3, %v200_v34  ;;  %772 = vmatprep.mubr.msk.f32.mxu0 %vm214_vm3, %v185_v35 }
  0x2c   : > { %796 = vmatprep.mubr.msk.f32.mxu1 %vm214_vm3, %v201_v36 }
  0x2e   : > { %773 = vmatmul.mubr.msk.f32.gmra.mrb[14].mxu0 %vm214_vm3, %v186_v37 }
  0x2f   : > { %797 = vmatmul.mubr.msk.f32.gmra.mrb[14].mxu1 %vm214_vm3, %v202_v38 }
  0xe5   : > { %v753_v39 = vpop.f32.mrb[0].mxu0 }
  0xe6   : > { %v777_v40 = vpop.f32.mrb[0].mxu1  ;;  %v381_v41 = vpop.f32.mrb[1].mxu0  ;;  %v387_v52 = vadd.f32 %v753_v39, %v958_v47 }
  0xe7   : > { %v461_v42 = vpop.f32.mrb[1].mxu1  ;;  %v467_v53 = vadd.f32 %v777_v40, %v958_v47  ;;  %v382_v54 = vadd.f32 %v958_v47, %v381_v41 }
  0xe8   : > { %v462_v55 = vadd.f32 %v958_v47, %v461_v42  ;;  %v541_v2 = vmax.f32 %v387_v52, 0.0 }
  0xe9   : > { %v756_v43 = vpop.f32.mrb[2].mxu0  ;;  %v557_v3 = vmax.f32 %v467_v53, 0.0  ;;  %v540_v6 = vmax.f32 %v382_v54, 0.0 }
  0xea   : > { %v780_v44 = vpop.f32.mrb[2].mxu1  ;;  %v391_v45 = vpop.f32.mrb[3].mxu0  ;;  %v965_v56 = vadd.f32 %v756_v43, %v958_v47  ;;  %v556_v7 = vmax.f32 %v462_v55, 0.0 }
  0xeb   : > { %v471_v46 = vpop.f32.mrb[3].mxu1  ;;  %v968_v57 = vadd.f32 %v780_v44, %v958_v47  ;;  %v971_v60 = vadd.f32 %v958_v47, %v391_v45 }
  0xec   : > { %v974_v61 = vadd.f32 %v958_v47, %v471_v46  ;;  %v543_v8 = vmax.f32 %v965_v56, 0.0 }
  0xed   : > { %v759_v48 = vpop.f32.mrb[4].mxu0  ;;  %v559_v9 = vmax.f32 %v968_v57, 0.0  ;;  %v542_v12 = vmax.f32 %v971_v60, 0.0 }
  0xee   : > { %v783_v49 = vpop.f32.mrb[4].mxu1  ;;  %v401_v50 = vpop.f32.mrb[5].mxu0  ;;  %v977_v0 = vadd.f32 %v759_v48, %v958_v47  ;;  %v558_v13 = vmax.f32 %v974_v61, 0.0 }
  0xef   : > { %v481_v51 = vpop.f32.mrb[5].mxu1  ;;  %v980_v1 = vadd.f32 %v783_v49, %v958_v47  ;;  %v983_v4 = vadd.f32 %v958_v47, %v401_v50 }
  0xf0   : > { %v986_v5 = vadd.f32 %v958_v47, %v481_v51  ;;  %v545_v18 = vmax.f32 %v977_v0, 0.0 }
  0xf1   : > { %v762_v58 = vpop.f32.mrb[6].mxu0  ;;  %v561_v19 = vmax.f32 %v980_v1, 0.0  ;;  %v544_v22 = vmax.f32 %v983_v4, 0.0 }
  0xf2   : > { %v786_v59 = vpop.f32.mrb[6].mxu1  ;;  %v411_v62 = vpop.f32.mrb[7].mxu0  ;;  %v560_v23 = vmax.f32 %v986_v5, 0.0  ;;  %v1002_v26 = vadd.f32 %v762_v58, %v958_v47 }
  0xf3   : > { %v491_v63 = vpop.f32.mrb[7].mxu1  ;;  %v1005_v27 = vadd.f32 %v786_v59, %v958_v47  ;;  %v412_v42 = vadd.f32 %v958_v47, %v411_v62 }
  0xf4   : > { %v492_v46 = vadd.f32 %v958_v47, %v491_v63  ;;  %v547_v63 = vmax.f32 %v1002_v26, 0.0 }
  0xf5   : > { %v765_v10 = vpop.f32.mrb[8].mxu0 }
  0xf6   : > { %v789_v11 = vpop.f32.mrb[8].mxu1  ;;  %v427_v14 = vadd.f32 %v765_v10, %v958_v47  ;;  %v421_v16 = vpop.f32.mrb[9].mxu0 }
  0xf7   : > { %v507_v15 = vadd.f32 %v789_v11, %v958_v47  ;;  %v501_v17 = vpop.f32.mrb[9].mxu1  ;;  %v422_v20 = vadd.f32 %v958_v47, %v421_v16 }
  0xf8   : > { %v502_v21 = vadd.f32 %v958_v47, %v501_v17  ;;  %v549_v24 = vmax.f32 %v427_v14, 0.0 }
  0xf9   : > { %v565_v25 = vmax.f32 %v507_v15, 0.0  ;;  %v548_v28 = vmax.f32 %v422_v20, 0.0  ;;  %v768_v30 = vpop.f32.mrb[10].mxu0 }
  0xfa   : > { %v564_v29 = vmax.f32 %v502_v21, 0.0  ;;  %v792_v31 = vpop.f32.mrb[10].mxu1  ;;  %v573_v32 = vmax.f32 %v541_v2, %v549_v24  ;;  %v437_v34 = vadd.f32 %v768_v30, %v958_v47  ;;  %v431_v36 = vpop.f32.mrb[11].mxu0  ;;  %v546_v21 = vmax.f32 %v412_v42, 0.0 }
  0xfb   : > { %v581_v33 = vmax.f32 %v557_v3, %v565_v25  ;;  %v517_v35 = vadd.f32 %v792_v31, %v958_v47  ;;  %v511_v37 = vpop.f32.mrb[11].mxu1  ;;  %v572_v38 = vmax.f32 %v540_v6, %v548_v28  ;;  %v432_v40 = vadd.f32 %v958_v47, %v431_v36 }
  0xfc   : > { %v580_v39 = vmax.f32 %v556_v7, %v564_v29  ;;  %v512_v41 = vadd.f32 %v958_v47, %v511_v37  ;;  %v551_v44 = vmax.f32 %v437_v34, 0.0  ;;  %v563_v3 = vmax.f32 %v1005_v27, 0.0 }
  0xfd   : > { %v589_v43 = vmax.f32 %v573_v32, %v581_v33  ;;  %v567_v45 = vmax.f32 %v517_v35, 0.0  ;;  %v550_v49 = vmax.f32 %v432_v40, 0.0  ;;  %v771_v51 = vpop.f32.mrb[12].mxu0  ;;  %v562_v25 = vmax.f32 %v492_v46, 0.0 }
  0xfe   : > { %v588_v48 = vmax.f32 %v572_v38, %v580_v39  ;;  %v566_v50 = vmax.f32 %v512_v41, 0.0  ;;  %v795_v52 = vpop.f32.mrb[12].mxu1  ;;  %v575_v53 = vmax.f32 %v543_v8, %v551_v44  ;;  %v447_v55 = vadd.f32 %v771_v51, %v958_v47  ;;  %v441_v57 = vpop.f32.mrb[13].mxu0 }
  0xff   : > { %598 = vst.msk [vmem:[%s1012_s4 + $0x8] sm:$0xff] %vm596_vm4, %v589_v43  ;;  %v583_v54 = vmax.f32 %v559_v9, %v567_v45  ;;  %v527_v56 = vadd.f32 %v795_v52, %v958_v47  ;;  %v521_v58 = vpop.f32.mrb[13].mxu1  ;;  %v574_v59 = vmax.f32 %v542_v12, %v550_v49  ;;  %v442_v61 = vadd.f32 %v958_v47, %v441_v57 }
 0x100   : > { %597 = vst.msk [vmem:[%s1012_s4] sm:$0xff] %vm596_vm4, %v588_v48  ;;  %v582_v60 = vmax.f32 %v558_v13, %v566_v50  ;;  %v522_v62 = vadd.f32 %v958_v47, %v521_v58  ;;  %v553_v1 = vmax.f32 %v447_v55, 0.0 }
 0x101   : > { %v591_v0 = vmax.f32 %v575_v53, %v583_v54  ;;  %v569_v2 = vmax.f32 %v527_v56, 0.0  ;;  %v552_v5 = vmax.f32 %v442_v61, 0.0  ;;  %v774_v7 = vpop.f32.mrb[14].mxu0 }
 0x102   : > { %v590_v4 = vmax.f32 %v574_v59, %v582_v60  ;;  %v568_v6 = vmax.f32 %v522_v62, 0.0  ;;  %v798_v8 = vpop.f32.mrb[14].mxu1  ;;  %v577_v9 = vmax.f32 %v545_v18, %v553_v1  ;;  %v457_v11 = vadd.f32 %v774_v7, %v958_v47  ;;  %v451_v13 = vpop.f32.mrb[15].mxu0 }
 0x103   : > { %600 = vst.msk [vmem:[%s1012_s4 + $0x18] sm:$0xff] %vm596_vm4, %v591_v0  ;;  %v585_v10 = vmax.f32 %v561_v19, %v569_v2  ;;  %v537_v12 = vadd.f32 %v798_v8, %v958_v47  ;;  %v531_v14 = vpop.f32.mrb[15].mxu1  ;;  %v576_v15 = vmax.f32 %v544_v22, %v552_v5  ;;  %v452_v17 = vadd.f32 %v958_v47, %v451_v13 }
 0x104   : > { %599 = vst.msk [vmem:[%s1012_s4 + $0x10] sm:$0xff] %vm596_vm4, %v590_v4  ;;  %v584_v16 = vmax.f32 %v560_v23, %v568_v6  ;;  %v532_v20 = vadd.f32 %v958_v47, %v531_v14  ;;  %v555_v19 = vmax.f32 %v457_v11, 0.0 }
 0x105   : > { %v593_v18 = vmax.f32 %v577_v9, %v585_v10  ;;  %v571_v24 = vmax.f32 %v537_v12, 0.0  ;;  %v554_v27 = vmax.f32 %v452_v17, 0.0 }
 0x106   : > { %v592_v26 = vmax.f32 %v576_v15, %v584_v16  ;;  %v570_v28 = vmax.f32 %v532_v20, 0.0  ;;  %v579_v29 = vmax.f32 %v547_v63, %v555_v19 }
 0x107   : > { %602 = vst.msk [vmem:[%s1012_s4 + $0x28] sm:$0xff] %vm596_vm4, %v593_v18  ;;  %v587_v30 = vmax.f32 %v563_v3, %v571_v24  ;;  %v578_v22 = vmax.f32 %v546_v21, %v554_v27 }
 0x108   : > { %601 = vst.msk [vmem:[%s1012_s4 + $0x20] sm:$0xff] %vm596_vm4, %v592_v26  ;;  %v586_v23 = vmax.f32 %v562_v25, %v570_v28 }
 0x109   : > { %v595_v31 = vmax.f32 %v579_v29, %v587_v30 }
 0x10a   : > { %v594_v47 = vmax.f32 %v578_v22, %v586_v23 }
 0x10b   : > { %604 = vst.msk [vmem:[%s1012_s4 + $0x38] sm:$0xff] %vm596_vm4, %v595_v31 }
 0x10c   : > { %603 = vst.msk [vmem:[%s1012_s4 + $0x30] sm:$0xff] %vm596_vm4, %v594_v47 }
 0x10d PF: > { %s13_s12 = sadd.s32 1, %s828_s12  }
 0x10e   : > { %p10_p4 = scmp.ge.s32.totalorder %s13_s12, 4  }
 0x110   :  { %12 = sbr.rel (!%p10_p4) target bundleno = 1 (0x1), region = 62 }

// kernel: vgg_forward.4
= control target key start
LH: loop header
LB: loop body
LE: loop exit
PB: predicated region body
PF: predicated region fallthrough
CT: control target
= control target key end

     0   :  { %s528_s12 = smov 0   ;;  %s597_s0 = inlined_call_operand.vmem [shape: f32[2,64,72], index: 0, kind: input, shape index: {}]   ;;  %s598_s1 = inlined_call_operand.vmem [shape: f32[72,16], index: 1, kind: input, shape index: {}]   ;;  %s599_s2 = inlined_call_operand.vmem [shape: f32[1,16], index: 2, kind: input, shape index: {}]   ;;  %s600_s3 = inlined_call_operand.vmem [shape: f32[2,16,16], index: 3, kind: output, shape index: {}]  }
   0x1 LB: > { %s397_s13 = sadd.s32 4294967295, %s506_s12   ;;  %p401_p0 = scmp.ge.s32.totalorder %s506_s12, 1  ;;  %s506_s12 = sphi %s528_s12, %s13_s12  }
   0x2   : > { %p137_p1 = scmp.lt.s32.totalorder %s506_s12, 3 }
   0x4   : > { %p138_p2 = pnand %p401_p0, %p137_p1 }
   0x5   : > { %v179_v0 = vld [vmem:[%s598_s1] sm:$0xff] (!%p138_p2)  ;;  %v180_v1 = vld [vmem:[%s598_s1 + $0x8] sm:$0xff] (!%p138_p2)  ;;  %v181_v2 = vld [vmem:[%s598_s1 + $0x10] sm:$0xff] (!%p138_p2)  ;;  %p161_p3 = scmp.lt.s32.totalorder (!%p138_p2), %s397_s13, 1  ;;  %vm195_vm0 = vcmask (!%p138_p2), 588800   ;;  %vm339_vm1 = vcmask (!%p138_p2), 130048  }
   0x6   : > { %141 = sbr.rel (%p138_p2) target bundleno = 253 (0xfd), region = 32  ;;  %v466_v3 = vpack.c.bf16 (!%p138_p2), %v180_v1, %v179_v0  ;;  %v182_v4 = vld [vmem:[%s598_s1 + $0x18] sm:$0xff] (!%p138_p2)  ;;  %v183_v6 = vld [vmem:[%s598_s1 + $0x20] sm:$0xff] (!%p138_p2)  ;;  %v184_v7 = vld [vmem:[%s598_s1 + $0x28] sm:$0xff] (!%p138_p2) }
   0x7   : > { %v470_v5 = vpack.c.bf16 (!%p138_p2), %v182_v4, %v181_v2  ;;  %v474_v8 = vpack.c.bf16 (!%p138_p2), %v184_v7, %v183_v6  ;;  %v185_v9 = vld [vmem:[%s598_s1 + $0x30] sm:$0xff] (!%p138_p2)  ;;  %v186_v10 = vld [vmem:[%s598_s1 + $0x38] sm:$0xff] (!%p138_p2)  ;;  %v187_v14 = vld [vmem:[%s598_s1 + $0x40] sm:$0xff] (!%p138_p2) }
   0x8   : > { %467 = vmatprep.subr.bf16.mxu0 (!%p138_p2), %v466_v3  ;;  %482 = vmatprep.subr.bf16.mxu1 (!%p138_p2), %v466_v3  ;;  %v478_v13 = vpack.c.bf16 (!%p138_p2), %v186_v10, %v185_v9  ;;  %v406_v22 = vld [vmem:[%s599_s2] ss:$0 sm:$0xff] (!%p138_p2) }
   0x9   : > { %469 = vmatpush3.bf16.msra.mxu0 (!%p138_p2), %v466_v3  ;;  %487 = vmatpush3.bf16.msra.mxu1 (!%p138_p2), %v466_v3 }
   0xa   : > { %471 = vmatprep.subr.bf16.mxu0 (!%p138_p2), %v470_v5  ;;  %483 = vmatprep.subr.bf16.mxu1 (!%p138_p2), %v470_v5 }
   0xd   : > { %s602_s13 = smov (!%p161_p3, %s397_s13), 1  ;;  %473 = vmatpush3.bf16.msra.mxu0 %v470_v5  ;;  %488 = vmatpush3.bf16.msra.mxu1 %v470_v5 }
   0xe   : > { %s417_s26 = sshll.u32 %s602_s13, 6  ;;  %475 = vmatprep.subr.bf16.mxu0 %v474_v8  ;;  %484 = vmatprep.subr.bf16.mxu1 %v474_v8  ;;  %s418_s11 = sshll.u32 %s602_s13, 4 }
   0xf   : > { %s563_s4 = scalar_lea.vmem %s597_s0, %s417_s26  ;;  %s170_s16 = scalar_lea.vmem %s600_s3, %s418_s11 }
  0x10   : > { %v171_v11 = vld [vmem:[%s563_s4] sm:$0xff]  ;;  %v172_v15 = vld [vmem:[%s563_s4 + $0x8] sm:$0xff]  ;;  %v173_v17 = vld [vmem:[%s563_s4 + $0x10] sm:$0xff] }
  0x11   : > { %v175_v12 = vld [vmem:[%s563_s4 + $0x20] sm:$0xff]  ;;  %454 = vmatprep.mubr.msk.f32.mxu0 %vm195_vm0, %v171_v11  ;;  %477 = vmatpush3.bf16.msra.mxu0 %v474_v8  ;;  %v176_v16 = vld [vmem:[%s563_s4 + $0x28] sm:$0xff]  ;;  %v177_v18 = vld [vmem:[%s563_s4 + $0x30] sm:$0xff] }
  0x12   : > { %460 = vmatprep.mubr.msk.f32.mxu1 %vm195_vm0, %v175_v12  ;;  %489 = vmatpush3.bf16.msra.mxu1 %v474_v8  ;;  %v174_v19 = vld [vmem:[%s563_s4 + $0x18] sm:$0xff] }
  0x13   : > { %479 = vmatprep.subr.bf16.mxu0 %v478_v13  ;;  %485 = vmatprep.subr.bf16.mxu1 %v478_v13  ;;  %v178_v20 = vld [vmem:[%s563_s4 + $0x38] sm:$0xff] }
  0x15   : > { %481 = vmatpush3.bf16.msra.mxu0 %v478_v13 }
  0x16   : > { %490 = vmatpush3.bf16.msra.mxu1 %v478_v13  ;;  %452 = vmatprep.subr.mxu0 %v187_v14 }
  0x17   : > { %486 = vmatprep.subr.mxu1 %v187_v14 }
  0x19   : > { %453 = vmatpush3.msra.mxu0 %v187_v14 }
  0x1a   : > { %491 = vmatpush3.msra.mxu1 %v187_v14  ;;  %455 = vmatmul.mubr.msk.f32.vlgmr.msra.gmra.mrb[0].mxu0 %vm195_vm0, %v172_v15 }
  0x1b   : > { %461 = vmatmul.mubr.msk.f32.vlgmr.msra.gmra.mrb[0].mxu1 %vm195_vm0, %v176_v16  ;;  %457 = vmatprep.mubr.msk.f32.mxu0 %vm195_vm0, %v173_v17 }
  0x1c   : > { %463 = vmatprep.mubr.msk.f32.mxu1 %vm195_vm0, %v177_v18 }
  0x1e   : > { %458 = vmatmul.mubr.msk.f32.gmra.mrb[2].mxu0 %vm195_vm0, %v174_v19 }
  0x1f   : > { %464 = vmatmul.mubr.msk.f32.gmra.mrb[2].mxu1 %vm195_vm0, %v178_v20 }
  0xed   : > { %v456_v21 = vpop.f32.mrb[0].mxu0 }
  0xee   : > { %v462_v23 = vpop.f32.mrb[0].mxu1  ;;  %v286_v24 = vpop.f32.mrb[1].mxu0  ;;  %v292_v26 = vadd.f32 %v456_v21, %v406_v22 }
  0xef   : > { %v306_v25 = vpop.f32.mrb[1].mxu1  ;;  %v312_v27 = vadd.f32 %v462_v23, %v406_v22  ;;  %v287_v28 = vadd.f32 %v406_v22, %v286_v24 }
  0xf0   : > { %v307_v29 = vadd.f32 %v406_v22, %v306_v25  ;;  %v326_v38 = vmax.f32 %v292_v26, 0.0 }
  0xf1   : > { %v459_v30 = vpop.f32.mrb[2].mxu0  ;;  %v330_v39 = vmax.f32 %v312_v27, 0.0  ;;  %v325_v42 = vmax.f32 %v287_v28, 0.0 }
  0xf2   : > { %v465_v31 = vpop.f32.mrb[2].mxu1  ;;  %v302_v32 = vadd.f32 %v459_v30, %v406_v22  ;;  %v296_v34 = vpop.f32.mrb[3].mxu0  ;;  %v329_v43 = vmax.f32 %v307_v29, 0.0 }
  0xf3   : > { %v322_v33 = vadd.f32 %v465_v31, %v406_v22  ;;  %v316_v35 = vpop.f32.mrb[3].mxu1  ;;  %v297_v36 = vadd.f32 %v406_v22, %v296_v34 }
  0xf4   : > { %v317_v37 = vadd.f32 %v406_v22, %v316_v35  ;;  %v328_v40 = vmax.f32 %v302_v32, 0.0 }
  0xf5   : > { %v332_v41 = vmax.f32 %v322_v33, 0.0  ;;  %v327_v44 = vmax.f32 %v297_v36, 0.0 }
  0xf6   : > { %v331_v45 = vmax.f32 %v317_v37, 0.0  ;;  %v334_v46 = vmax.f32 %v326_v38, %v328_v40 }
  0xf7   : > { %v336_v47 = vmax.f32 %v330_v39, %v332_v41  ;;  %v333_v48 = vmax.f32 %v325_v42, %v327_v44 }
  0xf8   : > { %v335_v49 = vmax.f32 %v329_v43, %v331_v45 }
  0xf9   : > { %v338_v50 = vmax.f32 %v334_v46, %v336_v47 }
  0xfa   : > { %v337_v51 = vmax.f32 %v333_v48, %v335_v49 }
  0xfb   : > { %341 = vst.msk [vmem:[%s170_s16 + $0x8] sm:$0xff] %vm339_vm1, %v338_v50 }
  0xfc   : > { %340 = vst.msk [vmem:[%s170_s16] sm:$0xff] %vm339_vm1, %v337_v51 }
  0xfd PF: > { %s13_s12 = sadd.s32 1, %s506_s12  }
  0xfe   : > { %p10_p4 = scmp.ge.s32.totalorder %s13_s12, 4  }
 0x100   :  { %12 = sbr.rel (!%p10_p4) target bundleno = 1 (0x1), region = 62 }

// kernel: vgg_forward.5
= control target key start
LH: loop header
LB: loop body
LE: loop exit
PB: predicated region body
PF: predicated region fallthrough
CT: control target
= control target key end

     0   :  { %12 = vsyncpa [#allocation3], 0  ;;  %s1201_s0 = inlined_call_operand.vmem [shape: f32[2,1,256], index: 0, kind: input, shape index: {}]   ;;  %s1202_s1 = inlined_call_operand.vmem [shape: f32[256,64], index: 1, kind: input, shape index: {}]   ;;  %s1203_s2 = inlined_call_operand.vmem [shape: f32[1,64], index: 2, kind: input, shape index: {}]   ;;  %s1204_s3 = inlined_call_operand.vmem [shape: f32[64,64], index: 3, kind: input, shape index: {}]   ;;  %s1205_s4 = inlined_call_operand.vmem [shape: f32[1,64], index: 4, kind: input, shape index: {}]   ;;  %s1206_s5 = inlined_call_operand.vmem [shape: f32[64,10], index: 5, kind: input, shape index: {}]   ;;  %s1207_s6 = inlined_call_operand.vmem [shape: f32[1,10], index: 6, kind: input, shape index: {}]   ;;  %s1208_s7 = inlined_call_operand.hbm [shape: f32[2,1,10], index: 7, kind: output, shape index: {}]  }
   0x1   :  { %14 = vsyncpa [#allocation3 + $0x1], 0  ;;  %s932_s24 = smov 0   ;;  %s934_s25 = smov 0  }
   0x2   :  { %s936_s26 = smov 0   ;;  %s938_s27 = smov 0  }
   0x3 LB: > { %s953_s28 = sadd.s32 4294967295, %s886_s27   ;;  %s625_s29 = sadd.s32 4294967294, %s886_s27   ;;  %s886_s27 = sphi %s938_s27, %s1214_s27   ;;  %s882_s26 = sphi %s936_s26, %s1213_s26   ;;  %s878_s25 = sphi %s934_s25, %s1212_s25   ;;  %s874_s24 = sphi %s932_s24, %s1211_s24  }
   0x4   : > { %s957_s30 = sadd.s32 1, %s886_s27   ;;  %s179_s8 = sadd.s32 1, %s882_s26 }
   0x5   : > { %s176_s9 = ssub.s32 %s886_s27, %s957_s30  ;;  %p189_p0 = scmp.ne.s32.totalorder %s882_s26, %s878_s25 }
   0x6   : > { %p177_p1 = scmp.eq.s32.totalorder %s176_s9, 0  ;;  %p190_p2 = scmp.eq.s32.totalorder %s953_s28, 1 }
   0x7   : > { %p195_p3 = scmp.ne.s32.totalorder %s878_s25, %s874_s24  ;;  %p196_p4 = scmp.eq.s32.totalorder %s625_s29, 1 }
   0x8   : > { %s968_s10 = scalar_select %p177_p1, %s882_s26, %s179_s8  }
   0x9   : > { %p970_p5 = por %p190_p2, %p189_p0  ;;  %p974_p6 = por %p196_p4, %p195_p3 }
   0xa   : > { %p628_p7 = scmp.ge.s32.totalorder %s886_s27, 1  ;;  %p239_p8 = scmp.lt.s32.totalorder %s886_s27, 3 }
   0xc   : > { %p240_p9 = pnand %p628_p7, %p239_p8 }
   0xd   : > { %v290_v0 = vld [vmem:[%s1202_s1 + $0x80] sm:$0xff] (!%p240_p9)  ;;  %v291_v1 = vld [vmem:[%s1202_s1 + $0x88] sm:$0xff] (!%p240_p9)  ;;  %p269_p10 = scmp.lt.s32.totalorder (!%p240_p9), %s953_s28, 1  ;;  %v308_v3 = vlaneseq (!%p240_p9)  ;;  %v292_v6 = vld [vmem:[%s1202_s1 + $0x90] sm:$0xff] (!%p240_p9)  ;;  %v888_v8 = vmov (!%p240_p9), 0.0|0.0   ;;  %vm889_vm0 = vmmov (!%p240_p9), 0  }
   0xe   : > { %243 = sbr.rel (%p240_p9) target bundleno = 711 (0x2c7), region = 48  ;;  %v274_v2 = vld [vmem:[%s1202_s1] sm:$0xff] (!%p240_p9)  ;;  %v726_v4 = vpack.c.bf16 (!%p240_p9), %v291_v1, %v290_v0  ;;  %v275_v5 = vld [vmem:[%s1202_s1 + $0x8] sm:$0xff] (!%p240_p9)  ;;  %v293_v7 = vld [vmem:[%s1202_s1 + $0x98] sm:$0xff] (!%p240_p9)  ;;  %758 = vmatprep.subr.bf16.mxu1 (!%p240_p9), %v888_v8  ;;  %vm398_vm1 = vcmask (!%p240_p9), 523264   ;;  %s632_s29 = sshll.u32 (!%p240_p9), %s953_s28, 4 }
   0xf   : > { %v728_v9 = vpack.c.bf16 (!%p240_p9), %v275_v5, %v274_v2  ;;  %v730_v10 = vpack.c.bf16 (!%p240_p9), %v293_v7, %v292_v6  ;;  %v276_v11 = vld [vmem:[%s1202_s1 + $0x10] sm:$0xff] (!%p240_p9)  ;;  %v277_v12 = vld [vmem:[%s1202_s1 + $0x18] sm:$0xff] (!%p240_p9)  ;;  %v294_v13 = vld [vmem:[%s1202_s1 + $0xa0] sm:$0xff] (!%p240_p9)  ;;  %v1013_v15 = vshrl.u32 (!%p240_p9), %v308_v3, 7  ;;  %vm555_vm2 = vcmask (!%p240_p9), 73728   ;;  %s1159_s14 = scalar_lea.hbm (!%p240_p9), %s1208_s7, %s632_s29 }
  0x10   : > { %727 = vmatprep.subr.bf16.mxu0 (!%p240_p9), %v726_v4  ;;  %v295_v14 = vld [vmem:[%s1202_s1 + $0xa8] sm:$0xff] (!%p240_p9)  ;;  %v732_v16 = vpack.c.bf16 (!%p240_p9), %v277_v12, %v276_v11  ;;  %v278_v18 = vld [vmem:[%s1202_s1 + $0x20] sm:$0xff] (!%p240_p9)  ;;  %v296_v20 = vld [vmem:[%s1202_s1 + $0xb0] sm:$0xff] (!%p240_p9)  ;;  %v890_v4 = vmov (!%p240_p9), 0.0  }
  0x11   : > { %729 = vmatpush3.bf16.msra.mxu0 (!%p240_p9), %v728_v9  ;;  %v734_v17 = vpack.c.bf16 (!%p240_p9), %v295_v14, %v294_v13  ;;  %v279_v19 = vld [vmem:[%s1202_s1 + $0x28] sm:$0xff] (!%p240_p9)  ;;  %v297_v21 = vld [vmem:[%s1202_s1 + $0xb8] sm:$0xff] (!%p240_p9)  ;;  %v314_v22 = vsub.s32 (!%p240_p9), 1, %v1013_v15  ;;  %v280_v25 = vld [vmem:[%s1202_s1 + $0x30] sm:$0xff] (!%p240_p9)  ;;  %v310_v59 = vsub.s32 (!%p240_p9), 0, %v1013_v15  ;;  %704 = vmatprep.mubr.msk.f32.mxu1 (!%p240_p9), %vm889_vm0, %v890_v4 }
  0x12   : > { %731 = vmatprep.subr.bf16.mxu0 (!%p240_p9), %v730_v10  ;;  %v736_v23 = vpack.c.bf16 (!%p240_p9), %v279_v19, %v278_v18  ;;  %v738_v24 = vpack.c.bf16 (!%p240_p9), %v297_v21, %v296_v20  ;;  %v281_v26 = vld [vmem:[%s1202_s1 + $0x38] sm:$0xff] (!%p240_p9)  ;;  %v298_v27 = vld [vmem:[%s1202_s1 + $0xc0] sm:$0xff] (!%p240_p9)  ;;  %v299_v28 = vld [vmem:[%s1202_s1 + $0xc8] sm:$0xff] (!%p240_p9) }
  0x13   : > { %v389_v31 = vld [vmem:[%s1204_s3] sm:$0xff] (!%p240_p9)  ;;  %v390_v32 = vld [vmem:[%s1204_s3 + $0x8] sm:$0xff] (!%p240_p9)  ;;  %v391_v33 = vld [vmem:[%s1204_s3 + $0x10] sm:$0xff] (!%p240_p9)  ;;  %v740_v34 = vpack.c.bf16 (!%p240_p9), %v281_v26, %v280_v25  ;;  %v742_v37 = vpack.c.bf16 (!%p240_p9), %v299_v28, %v298_v27 }
  0x14   : > { %v759_v35 = vpack.c.bf16 (!%p240_p9), %v390_v32, %v389_v31  ;;  %v392_v36 = vld [vmem:[%s1204_s3 + $0x18] sm:$0xff] (!%p240_p9)  ;;  %v282_v38 = vld [vmem:[%s1202_s1 + $0x40] sm:$0xff] (!%p240_p9)  ;;  %v283_v39 = vld [vmem:[%s1202_s1 + $0x48] sm:$0xff] (!%p240_p9) }
  0x15   : > { %s270_s17 = scalar_select %p269_p10, %s953_s28, 1  ;;  %733 = vmatpush3.bf16.msra.mxu0 %v732_v16  ;;  %v300_v40 = vld [vmem:[%s1202_s1 + $0xd0] sm:$0xff]  ;;  %v301_v41 = vld [vmem:[%s1202_s1 + $0xd8] sm:$0xff]  ;;  %v762_v42 = vpack.c.bf16 %v392_v36, %v391_v33  ;;  %v744_v43 = vpack.c.bf16 %v283_v39, %v282_v38  ;;  %v302_v47 = vld [vmem:[%s1202_s1 + $0xe0] sm:$0xff] }
  0x16   : > { %735 = vmatprep.subr.bf16.mxu0 %v734_v17  ;;  %760 = vmatpush3.bf16.msra.mxu1 %v759_v35  ;;  %v746_v44 = vpack.c.bf16 %v301_v41, %v300_v40  ;;  %v284_v45 = vld [vmem:[%s1202_s1 + $0x50] sm:$0xff]  ;;  %v285_v46 = vld [vmem:[%s1202_s1 + $0x58] sm:$0xff]  ;;  %v303_v48 = vld [vmem:[%s1202_s1 + $0xe8] sm:$0xff]  ;;  %s891_s28 = smov [#allocation2]  }
  0x17   : > { %s629_s20 = sshll.u32 %s270_s17, 1  ;;  %761 = vmatprep.subr.bf16.mxu1 %v888_v8  ;;  %v748_v49 = vpack.c.bf16 %v285_v46, %v284_v45  ;;  %v750_v50 = vpack.c.bf16 %v303_v48, %v302_v47  ;;  %v286_v51 = vld [vmem:[%s1202_s1 + $0x60] sm:$0xff]  ;;  %v287_v52 = vld [vmem:[%s1202_s1 + $0x68] sm:$0xff]  ;;  %v304_v53 = vld [vmem:[%s1202_s1 + $0xf0] sm:$0xff]  ;;  %s828_s18 = sshll.u32 %s891_s28, 4  ;;  %s829_s18 = int_to_ptr.vmem [resolvable:$false] %s828_s18 }
  0x18   : > { %s272_s17 = scalar_lea.vmem %s1201_s0, %s629_s20  ;;  %v305_v54 = vld [vmem:[%s1202_s1 + $0xf8] sm:$0xff]  ;;  %v752_v55 = vpack.c.bf16 %v287_v52, %v286_v51  ;;  %v288_v57 = vld [vmem:[%s1202_s1 + $0x70] sm:$0xff]  ;;  %v393_v62 = vld [vmem:[%s1204_s3 + $0x20] sm:$0xff]  ;;  %s830_s19 = scalar_lea.vmem %s829_s18, 32 }
  0x19   : > { %v273_v29 = vld [vmem:[%s272_s17] sm:$0x3]  ;;  %737 = vmatpush3.bf16.msra.mxu0 %v736_v23  ;;  %v754_v56 = vpack.c.bf16 %v305_v54, %v304_v53  ;;  %v289_v58 = vld [vmem:[%s1202_s1 + $0x78] sm:$0xff]  ;;  %v394_v63 = vld [vmem:[%s1204_s3 + $0x28] sm:$0xff]  ;;  %s267_s17 = sand.u32 1, %s878_s25  }
  0x1a   : > { %v315_v30 = vrot.slane %v273_v29, %v314_v22  ;;  %739 = vmatprep.subr.bf16.mxu0 %v738_v24  ;;  %763 = vmatpush3.bf16.msra.mxu1 %v762_v42  ;;  %v756_v60 = vpack.c.bf16 %v289_v58, %v288_v57  ;;  %v311_v61 = vrot.slane %v273_v29, %v310_v59  ;;  %v395_v1 = vld [vmem:[%s1204_s3 + $0x30] sm:$0xff]  ;;  %v396_v2 = vld [vmem:[%s1204_s3 + $0x38] sm:$0xff]  ;;  %v306_v6 = vld [vmem:[%s1203_s2] sm:$0x1]  ;;  %s268_s8 = scalar_lea.vmem [#allocation2], %s267_s17  ;;  %s558_s15 = scalar_lea.sflag [#allocation3], %s267_s17 }
  0x1b   : > { %764 = vmatprep.subr.bf16.mxu1 %v888_v8  ;;  %v765_v0 = vpack.c.bf16 %v394_v63, %v393_v62  ;;  %v768_v3 = vpack.c.bf16 %v396_v2, %v395_v1  ;;  %v473_v10 = vld [vmem:[%s1206_s5] sm:$0xff]  ;;  %v474_v11 = vld [vmem:[%s1206_s5 + $0x8] sm:$0xff]  ;;  %v475_v15 = vld [vmem:[%s1206_s5 + $0x10] sm:$0xff]  ;;  %s570_s20 = sshll.u32 %s268_s8, 4  ;;  %s1161_s20 = int_to_ptr.vmem [resolvable:$true] %s570_s20 }
  0x1c   : > { %382 = vmatprep.mubr.f32.mxu0 %v315_v30  ;;  %v771_v13 = vpack.c.bf16 %v474_v11, %v473_v10  ;;  %v476_v16 = vld [vmem:[%s1206_s5 + $0x18] sm:$0xff]  ;;  %v477_v18 = vld [vmem:[%s1206_s5 + $0x20] sm:$0xff]  ;;  %v478_v19 = vld [vmem:[%s1206_s5 + $0x28] sm:$0xff]  ;;  %s824_s16 = scalar_lea.vmem %s1161_s20, 16  ;;  %p831_p0 = scmp.lt.s32.totalorder %s1161_s20, %s829_s18 }
  0x1d   : > { %741 = vmatpush3.bf16.msra.mxu0 %v740_v34  ;;  %v774_v17 = vpack.c.bf16 %v476_v16, %v475_v15  ;;  %v777_v20 = vpack.c.bf16 %v478_v19, %v477_v18  ;;  %v479_v21 = vld [vmem:[%s1206_s5 + $0x30] sm:$0xff]  ;;  %v480_v22 = vld [vmem:[%s1206_s5 + $0x38] sm:$0xff]  ;;  %v397_v24 = vld [vmem:[%s1205_s4] sm:$0x1]  ;;  %p825_p11 = scmp.ne.s32.totalorder %s1161_s20, %s824_s16  ;;  %p832_p1 = scmp.lt.s32.totalorder %s830_s19, %s824_s16 }
  0x1e   : > { %743 = vmatprep.subr.bf16.mxu0 %v742_v37  ;;  %766 = vmatpush3.bf16.msra.mxu1 %v765_v0  ;;  %v780_v23 = vpack.c.bf16 %v480_v22, %v479_v21 }
  0x1f   : > { %767 = vmatprep.subr.bf16.mxu1 %v888_v8  ;;  %p826_p12 = pnand %p825_p11, %p970_p5  ;;  %p833_p2 = por %p832_p1, %p831_p0 }
  0x21   : > { %745 = vmatpush3.bf16.msra.mxu0 %v744_v43  ;;  %p827_p13 = pneg %p826_p12 }
  0x22   : > { %747 = vmatprep.subr.bf16.mxu0 %v746_v44  ;;  %769 = vmatpush3.bf16.msra.mxu1 %v768_v3 }
  0x23   : > { %770 = vmatprep.subr.bf16.mxu1 %v888_v8  ;;  %p834_p3 = pnand %p833_p2, %p827_p13 }
  0x25   : > { %749 = vmatpush3.bf16.msra.mxu0 %v748_v49 }
  0x26   : > { %751 = vmatprep.subr.bf16.mxu0 %v750_v50 }
  0x29   : > { %753 = vmatpush3.bf16.msra.mxu0 %v752_v55 }
  0x2a   : > { %755 = vmatprep.subr.bf16.mxu0 %v754_v56 }
  0x2d   : > { %757 = vmatpush3.bf16.msra.mxu0 %v756_v60 }
  0x30   : > { %383 = vmatmul.mubr.f32.vlgmr.msra.gmra.mrb[0].mxu0 %v311_v61 }
 0x103   : > { %v667_v5 = vpop.f32.mrb[0].mxu0 }
 0x104   : > { %v668_v7 = vpop.f32.mrb[1].mxu0 }
 0x105   : > { %v669_v9 = vadd.f32 %v668_v7, %v667_v5 }
 0x107   : > { %v385_v12 = vadd.f32 %v669_v9, %v306_v6 }
 0x109   : > { %v388_v14 = vmax.f32 %v385_v12, 0.0 }
 0x10b   : > { %705 = vmatmul.mubr.msk.f32.vlgmr.msra.gmra.mrb[0].mxu1 %vm398_vm1, %v388_v14 }
 0x10c   : > { %772 = vmatpush3.bf16.msra.mxu1 %v771_v13  ;;  %723 = vmatprep.mubr.msk.f32.mxu1 %vm889_vm0, %v890_v4 }
 0x10d   : > { %773 = vmatprep.subr.bf16.mxu1 %v888_v8 }
 0x110   : > { %775 = vmatpush3.bf16.msra.mxu1 %v774_v17 }
 0x111   : > { %776 = vmatprep.subr.bf16.mxu1 %v888_v8 }
 0x114   : > { %778 = vmatpush3.bf16.msra.mxu1 %v777_v20 }
 0x115   : > { %779 = vmatprep.subr.bf16.mxu1 %v888_v8  ;;  %v481_v8 = vld [vmem:[%s1207_s6] sm:$0x1] }
 0x118   : > { %781 = vmatpush3.bf16.msra.mxu1 %v780_v23 }
 0x1de   : > { %v468_v25 = vpop.f32.mrb[0].mxu1 }
 0x1df   : > { %v469_v26 = vadd.f32 %v468_v25, %v397_v24  ;;  %v706_v27 = vpop.f32.mrb[1].mxu1 }
 0x1e1   : > { %v472_v28 = vmax.f32 %v469_v26, 0.0 }
 0x1e3   : > { %724 = vmatmul.mubr.msk.f32.vlgmr.msra.gmra.mrb[2].mxu1 %vm398_vm1, %v472_v28 }
 0x2b6   : > { %v551_v29 = vpop.f32.mrb[2].mxu1 }
 0x2b7   : > { %v552_v30 = vadd.f32 %v551_v29, %v481_v8  ;;  %v725_v31 = vpop.f32.mrb[3].mxu1 }
 0x2b9   : > { %556 = vst.msk [vmem:[%s268_s8] sm:$0x1] %vm555_vm2, %v552_v30 }
 0x2ba   : > { %837 = shalt.err (!%p834_p3)
}
 0x2bb   : > { %s838_s21 = scalar_lea.hbm %s1159_s14, 16  ;;  %s842_s23 = scalar_lea.hbm %s1208_s7, 32 }
 0x2bc   : > { %p839_p4 = scmp.ne.s32.totalorder %s1159_s14, %s838_s21  ;;  %p843_p9 = scmp.lt.u32.totalorder %s1159_s14, %s1208_s7 }
 0x2bd   : > { %p844_p10 = scmp.lt.u32.totalorder %s842_s23, %s838_s21  ;;  %p846_p12 = scmp.lt.u32.totalorder %s838_s21, %s1159_s14 }
 0x2be   : > { %p840_p7 = pnand %p839_p4, %p970_p5 }
 0x2bf   : > { %p845_p11 = por %p844_p10, %p843_p9 }
 0x2c0   : > { %p841_p8 = pneg %p840_p7 }
 0x2c1   : > { %p847_p13 = por %p846_p12, %p845_p11 }
 0x2c3   : > { %p848_p0 = pnand %p847_p13, %p841_p8 }
 0x2c5   : > { %851 = shalt.err (!%p848_p0)
}
 0x2c6   : > { %782 = dma.vmem_to_hbm [thread:$0]  (%p970_p5), %s1161_s20, 16, %s1159_s14, %s558_s15  }
 0x2c7 PF: > { %p788_p1 = scmp.ge.s32.totalorder %s886_s27, 2  ;;  %s582_s9 = sand.u32 1, %s874_s24  }
 0x2c8   : > { %s583_s13 = scalar_lea.sflag [#allocation3], %s582_s9 }
 0x2c9   : > { %p785_p2 = pnand %p788_p1, %p974_p6 }
 0x2cb   : > { %869 = dma.done.wait (!%p785_p2), %s583_s13, 16  }
 0x2cc   : > { %871 = vsyncadd (!%p785_p2), %s583_s13, 4294967280  ;;  %p17_p3 = scmp.ge.s32.totalorder %s957_s30, 4   ;;  %s1211_s24 = smov %s878_s25 }
 0x2cd   : > { %s1212_s25 = smov %s882_s26  ;;  %s1213_s26 = smov %s968_s10 }
 0x2ce   : > { %s1214_s27 = smov %s957_s30  ;;  %19 = sbr.rel (!%p17_p3) target bundleno = 3 (0x3), region = 83 }
 0x2d5   :  { %587 = vsyncpa [#allocation3], 1 }
 0x2d6   :  { %589 = vsyncpa [#allocation3 + $0x1], 1 }

</bundles_post_ra>
